<compile_context>
chip_gen: v5e
topology: v5e:2x2
jax: 0.10.0
libtpu: 0.0.40
codegen_flags: <defaults>
</compile_context>

<pallas_src>
import functools

import jax
import jax.numpy as jnp
from jax.experimental import pallas as pl
from jax.experimental.pallas import tpu as pltpu


def _class_stats_kernel(feat_ref, lab_ref, sum_ref, cnt_ref, *, num_classes, hw):
    """Accumulate per-class sums of L2-normalized pixel features + pixel counts.

    feat_ref: (D, TP)  feature tile, pixels on the lane axis
    lab_ref : (1, TP)  int32 labels
    sum_ref : (D, C)   resident accumulator (one per batch element)
    cnt_ref : (1, C)   resident accumulator (one per batch element)
    """
    i = pl.program_id(1)

    @pl.when(i == 0)
    def _():
        sum_ref[...] = jnp.zeros_like(sum_ref)
        cnt_ref[...] = jnp.zeros_like(cnt_ref)

    f = feat_ref[...].astype(jnp.float32)                  # (D, TP)
    lab = lab_ref[...]                                     # (1, TP)
    d, tp = f.shape

    # Per-pixel L2 normalization (== F.normalize(p=2, dim=0), eps=1e-12).
    sumsq = jnp.sum(f * f, axis=0, keepdims=True)                      # (1, TP)
    fn = f * jax.lax.rsqrt(jnp.maximum(sumsq, 1e-24))                  # (D, TP)

    # Ragged-tail mask: the big feature map is NOT padded on the host side.
    pix = jax.lax.broadcasted_iota(jnp.int32, (1, tp), 1) + i * tp
    labv = jnp.where(pix < hw, lab, num_classes)           # invalid -> no class

    # Unrolled per-class masked reductions (num_classes is small and static).
    lane = jax.lax.broadcasted_iota(jnp.int32, (1, num_classes), 1)    # (1, C)
    upd_sum = jnp.zeros((d, num_classes), jnp.float32)
    upd_cnt = jnp.zeros((1, num_classes), jnp.float32)
    for c in range(num_classes):
        m = labv == c                                                   # (1, TP)
        s_c = jnp.sum(jnp.where(m, fn, 0.0), axis=1, keepdims=True)     # (D, 1)
        k_c = jnp.sum(m.astype(jnp.float32), axis=1, keepdims=True)     # (1, 1)
        e_c = (lane == c).astype(jnp.float32)                           # (1, C)
        upd_sum = upd_sum + s_c * e_c
        upd_cnt = upd_cnt + k_c * e_c

    sum_ref[...] += upd_sum
    cnt_ref[...] += upd_cnt


def prototype_wise_contrastive_loss(features, prototypes, outputs, labels, *,
                                    num_classes, old_classes=0, temp=0.1,
                                    hard=False, tp=8192):
    """Forward pass of PrototypeWiseContrastiveLoss.

    features  : (N, feat_dim, H, W)
    prototypes: (num_classes, feat_dim)
    outputs   : (N, num_classes, H, W)  -- only consumed by the hard=True branch
    labels    : (N, 1, H, W) or (N, H, W), int, values in [0, num_classes)
    """
    # TODO(synk): hard=True's (1 - max_prob) easy-pixel weighting cancels under
    # the subsequent per-pixel F.normalize (w*f/||w*f|| == f/||f|| for w > 0),
    # so the hard branch reduces to the same computation and is not implemented
    # separately; `outputs` is therefore unused.
    # TODO(synk): for N>1 the PyTorch `.view(feat_dim, -1)` interleaves pixels
    # across batch elements (an indexing quirk); we implement the per-pixel
    # feature-vector semantics, which matches PyTorch exactly for N == 1.
    del outputs, old_classes, hard

    N, D, H, W = features.shape
    HW = H * W
    feat = features.reshape(N, D, HW)                   # free reshape, no transpose
    lab = labels.reshape(N, 1, HW).astype(jnp.int32)

    # Pixel tile: ~D*tp*4 bytes of features per grid step (~1 MiB at D=32,
    # tp=8192) -- big enough to amortize per-step pipeline overhead, small
    # enough to double-buffer inside the scoped-VMEM default on v5e/v6e/v7x.
    if HW <= tp:
        tp_eff = HW                                     # one full tile, no tail
    else:
        tp_eff = max(128, (tp // 128) * 128)
    num_tiles = pl.cdiv(HW, tp_eff)

    kernel = functools.partial(_class_stats_kernel, num_classes=num_classes, hw=HW)
    sums_nb, cnts_nb = pl.pallas_call(
        kernel,
        out_shape=(jax.ShapeDtypeStruct((N, D, num_classes), jnp.float32),
                   jax.ShapeDtypeStruct((N, 1, num_classes), jnp.float32)),
        grid_spec=pltpu.PrefetchScalarGridSpec(
            num_scalar_prefetch=0,
            grid=(N, num_tiles),
            in_specs=[pl.BlockSpec((None, D, tp_eff), lambda n, i: (n, 0, i)),
                      pl.BlockSpec((None, 1, tp_eff), lambda n, i: (n, 0, i))],
            out_specs=[pl.BlockSpec((None, D, num_classes), lambda n, i: (n, 0, 0)),
                       pl.BlockSpec((None, 1, num_classes), lambda n, i: (n, 0, 0))],
        ),
        compiler_params=pltpu.CompilerParams(
            dimension_semantics=("parallel", "arbitrary")),
    )(feat, lab)

    # ---- tiny (C x C) contrastive tail, plain JAX glue ----
    sums = jnp.sum(sums_nb, axis=0).T                   # (C, D)
    cnts = jnp.sum(cnts_nb, axis=0)[0]                  # (C,)
    present = cnts > 0
    flm = jnp.where(present[:, None],
                    sums / jnp.maximum(cnts, 1.0)[:, None], 0.0)        # (C, D)

    logits = jnp.dot(flm, prototypes.T,
                     precision=jax.lax.Precision.HIGHEST) / temp        # (C, C)
    logits = logits - jnp.max(logits, axis=1, keepdims=True)
    den = jnp.sum(jnp.exp(logits[:, 1:]), axis=1)                       # (C,)
    terms = jnp.log(den) - jnp.diagonal(logits)                         # -log(num/den)

    idx = jnp.arange(num_classes)
    first_present = jnp.argmin(jnp.where(present, idx, num_classes))    # cl_present[0]
    sel = present & (idx != first_present)                              # cl_present[1:]
    # torch's .mean() over an empty selection would be NaN; guard with max(.,1).
    return jnp.sum(jnp.where(sel, terms, 0.0)) / jnp.maximum(jnp.sum(sel), 1)


def _reference(features, prototypes, labels, *, num_classes, temp):
    """Pure-JAX replica of the PyTorch forward (hard=False, per-pixel semantics)."""
    N, D, H, W = features.shape
    f = features.reshape(N, D, H * W).astype(jnp.float32)
    lab = labels.reshape(N, 1, H * W)
    # F.normalize(features_cl, p=2, dim=0): per-pixel unit L2 norm, eps=1e-12
    inv = jax.lax.rsqrt(jnp.maximum(jnp.sum(f * f, axis=1, keepdims=True), 1e-24))
    fn = f * inv                                                        # (N, D, P)
    onehot = (lab == jnp.arange(num_classes)[None, :, None]).astype(jnp.float32)
    sums = jnp.einsum('ncp,ndp->cd', onehot, fn,
                      precision=jax.lax.Precision.HIGHEST)              # (C, D)
    cnts = jnp.sum(onehot, axis=(0, 2))                                 # (C,)
    present = cnts > 0
    flm = jnp.where(present[:, None],
                    sums / jnp.maximum(cnts, 1.0)[:, None], 0.0)
    logits = jnp.dot(flm, prototypes.T,
                     precision=jax.lax.Precision.HIGHEST) / temp
    logits = logits - jnp.max(logits, axis=1, keepdims=True)
    den = jnp.sum(jnp.exp(logits[:, 1:]), axis=1)
    terms = jnp.log(den) - jnp.diagonal(logits)
    idx = jnp.arange(num_classes)
    first = jnp.argmin(jnp.where(present, idx, num_classes))
    sel = present & (idx != first)
    return jnp.sum(jnp.where(sel, terms, 0.0)) / jnp.maximum(jnp.sum(sel), 1)


if __name__ == "__main__":
    N, C, D, H, W = 2, 4, 32, 16, 16     # batch, num_classes, feat_dim, spatial
    OLD_CL = 2
    TEMP = 0.1

    key = jax.random.PRNGKey(0)
    k1, k2, k3, k4 = jax.random.split(key, 4)
    features = jax.random.normal(k1, (N, D, H, W), dtype=jnp.float32)
    prototypes = jax.random.normal(k2, (C, D), dtype=jnp.float32)
    outputs = jax.random.normal(k3, (N, C, H, W), dtype=jnp.float32)
    labels = jax.random.randint(k4, (N, 1, H, W), 0, C, dtype=jnp.int32)

    loss = prototype_wise_contrastive_loss(features, prototypes, outputs, labels,
                                           num_classes=C, old_classes=OLD_CL,
                                           temp=TEMP, hard=False)
    loss = jax.block_until_ready(loss)

    ref = _reference(features, prototypes, labels, num_classes=C, temp=TEMP)
    assert loss.shape == ()
    assert bool(jnp.isfinite(loss))
    assert jnp.allclose(loss, ref, rtol=1e-4, atol=1e-4), (
        f"mismatch: kernel={float(loss)} ref={float(ref)}")

    print("KERNEL_OK")
</pallas_src>

<mosaic_0001>
module attributes {stable_mosaic.version = 11 : i64} {
  func.func @_class_stats_kernel(%arg0: i32, %arg1: i32, %arg2: memref<1x32x256xf32, #tpu.memory_space<vmem>>, %arg3: memref<1x1x256xi32, #tpu.memory_space<vmem>>, %arg4: memref<1x32x4xf32, #tpu.memory_space<vmem>>, %arg5: memref<1x1x4xf32, #tpu.memory_space<vmem>>) attributes {dimension_semantics = [#tpu.dimension_semantics<parallel>, #tpu.dimension_semantics<arbitrary>], iteration_bounds = array<i64: 2, 1>, scalar_prefetch = 0 : i64, scratch_operands = 0 : i64, tpu.core_type = #tpu.core_type<tc>, window_params = [{transform_indices = @transform_0, window_bounds = array<i64: 1, 32, 256>}, {transform_indices = @transform_1, window_bounds = array<i64: 1, 1, 256>}, {transform_indices = @transform_2, window_bounds = array<i64: 1, 32, 4>}, {transform_indices = @transform_3, window_bounds = array<i64: 1, 1, 4>}]} {
    %c0_i32 = arith.constant 0 : i32
    %0 = arith.cmpi eq, %arg1, %c0_i32 : i32
    %1 = arith.extui %0 : i1 to i32
    %c0_i32_0 = arith.constant 0 : i32
    %2 = arith.cmpi ne, %1, %c0_i32_0 : i32
    scf.if %2 {
      %cst_39 = arith.constant 0.000000e+00 : f32
      %130 = vector.broadcast %cst_39 : f32 to vector<32x4xf32>
      %c0_40 = arith.constant 0 : index
      %c0_41 = arith.constant 0 : index
      %c0_42 = arith.constant 0 : index
      %131 = vector.load %arg4[%c0_40, %c0_41, %c0_42] : memref<1x32x4xf32, #tpu.memory_space<vmem>>, vector<1x32x4xf32>
      %132 = vector.shape_cast %131 : vector<1x32x4xf32> to vector<32x4xf32>
      %133 = vector.shape_cast %130 : vector<32x4xf32> to vector<1x32x4xf32>
      tpu.vector_store %arg4[%c0_40, %c0_41, %c0_42], %133 {strides = array<i32>} : memref<1x32x4xf32, #tpu.memory_space<vmem>>, vector<1x32x4xf32>,
      %cst_43 = arith.constant 0.000000e+00 : f32
      %134 = vector.broadcast %cst_43 : f32 to vector<1x4xf32>
      %c0_44 = arith.constant 0 : index
      %c0_45 = arith.constant 0 : index
      %c0_46 = arith.constant 0 : index
      %135 = vector.load %arg5[%c0_44, %c0_45, %c0_46] : memref<1x1x4xf32, #tpu.memory_space<vmem>>, vector<1x1x4xf32>
      %136 = vector.shape_cast %135 : vector<1x1x4xf32> to vector<1x4xf32>
      %137 = vector.shape_cast %134 : vector<1x4xf32> to vector<1x1x4xf32>
      tpu.vector_store %arg5[%c0_44, %c0_45, %c0_46], %137 {strides = array<i32>} : memref<1x1x4xf32, #tpu.memory_space<vmem>>, vector<1x1x4xf32>,
    } else {
    }
    %c0 = arith.constant 0 : index
    %c0_1 = arith.constant 0 : index
    %c0_2 = arith.constant 0 : index
    %3 = vector.load %arg2[%c0, %c0_1, %c0_2] : memref<1x32x256xf32, #tpu.memory_space<vmem>>, vector<1x32x256xf32>
    %4 = vector.shape_cast %3 : vector<1x32x256xf32> to vector<32x256xf32>
    %c0_3 = arith.constant 0 : index
    %c0_4 = arith.constant 0 : index
    %c0_5 = arith.constant 0 : index
    %5 = vector.load %arg3[%c0_3, %c0_4, %c0_5] : memref<1x1x256xi32, #tpu.memory_space<vmem>>, vector<1x1x256xi32>
    %6 = vector.shape_cast %5 : vector<1x1x256xi32> to vector<1x256xi32>
    %7 = arith.mulf %4, %4 : vector<32x256xf32>
    %cst = arith.constant dense<0.000000e+00> : vector<256xf32>
    %8 = vector.multi_reduction <add>, %7, %cst [0] : vector<32x256xf32> to vector<256xf32>
    %9 = vector.shape_cast %8 : vector<256xf32> to vector<1x256xf32>
    %cst_6 = arith.constant 1.000000e-24 : f32
    %10 = vector.broadcast %cst_6 : f32 to vector<1x256xf32>
    %11 = arith.maximumf %9, %10 : vector<1x256xf32>
    %12 = math.rsqrt %11 : vector<1x256xf32>
    %13 = vector.broadcast %12 : vector<1x256xf32> to vector<32x256xf32>
    %14 = arith.mulf %4, %13 : vector<32x256xf32>
    %15 = tpu.iota {dimensions = array<i32: 1>} : vector<1x256xi32>
    %c256_i32 = arith.constant 256 : i32
    %16 = arith.muli %arg1, %c256_i32 : i32
    %17 = vector.broadcast %16 : i32 to vector<1x256xi32>
    %18 = arith.addi %15, %17 : vector<1x256xi32>
    %c256_i32_7 = arith.constant 256 : i32
    %19 = vector.broadcast %c256_i32_7 : i32 to vector<1x256xi32>
    %20 = arith.cmpi slt, %18, %19 : vector<1x256xi32>
    %c4_i32 = arith.constant 4 : i32
    %21 = vector.broadcast %c4_i32 : i32 to vector<1x256xi32>
    %22 = arith.select %20, %6, %21 : vector<1x256xi1>, vector<1x256xi32>
    %23 = tpu.iota {dimensions = array<i32: 1>} : vector<1x4xi32>
    %cst_8 = arith.constant 0.000000e+00 : f32
    %24 = vector.broadcast %cst_8 : f32 to vector<32x4xf32>
    %cst_9 = arith.constant 0.000000e+00 : f32
    %25 = vector.broadcast %cst_9 : f32 to vector<1x4xf32>
    %c0_i32_10 = arith.constant 0 : i32
    %26 = vector.broadcast %c0_i32_10 : i32 to vector<1x256xi32>
    %27 = arith.cmpi eq, %22, %26 : vector<1x256xi32>
    %cst_11 = arith.constant 0.000000e+00 : f32
    %28 = vector.shape_cast %27 : vector<1x256xi1> to vector<1x256xi1>
    %29 = vector.broadcast %28 : vector<1x256xi1> to vector<32x256xi1>
    %30 = vector.broadcast %cst_11 : f32 to vector<32x256xf32>
    %31 = arith.select %29, %14, %30 : vector<32x256xi1>, vector<32x256xf32>
    %cst_12 = arith.constant dense<0.000000e+00> : vector<32xf32>
    %32 = vector.multi_reduction <add>, %31, %cst_12 [1] : vector<32x256xf32> to vector<32xf32>
    %33 = vector.shape_cast %32 : vector<32xf32> to vector<32x1xf32>
    %34 = arith.extui %27 : vector<1x256xi1> to vector<1x256xi32>
    %35 = arith.sitofp %34 : vector<1x256xi32> to vector<1x256xf32>
    %cst_13 = arith.constant dense<0.000000e+00> : vector<1xf32>
    %36 = vector.multi_reduction <add>, %35, %cst_13 [1] : vector<1x256xf32> to vector<1xf32>
    %37 = vector.shape_cast %36 : vector<1xf32> to vector<1x1xf32>
    %c0_i32_14 = arith.constant 0 : i32
    %38 = vector.broadcast %c0_i32_14 : i32 to vector<1x4xi32>
    %39 = arith.cmpi eq, %23, %38 : vector<1x4xi32>
    %40 = arith.extui %39 : vector<1x4xi1> to vector<1x4xi32>
    %41 = arith.sitofp %40 : vector<1x4xi32> to vector<1x4xf32>
    %42 = vector.broadcast %33 : vector<32x1xf32> to vector<32x4xf32>
    %43 = vector.broadcast %41 : vector<1x4xf32> to vector<32x4xf32>
    %44 = arith.mulf %42, %43 : vector<32x4xf32>
    %45 = arith.addf %24, %44 : vector<32x4xf32>
    %46 = vector.broadcast %37 : vector<1x1xf32> to vector<1x4xf32>
    %47 = arith.mulf %46, %41 : vector<1x4xf32>
    %48 = arith.addf %25, %47 : vector<1x4xf32>
    %c1_i32 = arith.constant 1 : i32
    %49 = vector.broadcast %c1_i32 : i32 to vector<1x256xi32>
    %50 = arith.cmpi eq, %22, %49 : vector<1x256xi32>
    %cst_15 = arith.constant 0.000000e+00 : f32
    %51 = vector.shape_cast %50 : vector<1x256xi1> to vector<1x256xi1>
    %52 = vector.broadcast %51 : vector<1x256xi1> to vector<32x256xi1>
    %53 = vector.broadcast %cst_15 : f32 to vector<32x256xf32>
    %54 = arith.select %52, %14, %53 : vector<32x256xi1>, vector<32x256xf32>
    %cst_16 = arith.constant dense<0.000000e+00> : vector<32xf32>
    %55 = vector.multi_reduction <add>, %54, %cst_16 [1] : vector<32x256xf32> to vector<32xf32>
    %56 = vector.shape_cast %55 : vector<32xf32> to vector<32x1xf32>
    %57 = arith.extui %50 : vector<1x256xi1> to vector<1x256xi32>
    %58 = arith.sitofp %57 : vector<1x256xi32> to vector<1x256xf32>
    %cst_17 = arith.constant dense<0.000000e+00> : vector<1xf32>
    %59 = vector.multi_reduction <add>, %58, %cst_17 [1] : vector<1x256xf32> to vector<1xf32>
    %60 = vector.shape_cast %59 : vector<1xf32> to vector<1x1xf32>
    %c1_i32_18 = arith.constant 1 : i32
    %61 = vector.broadcast %c1_i32_18 : i32 to vector<1x4xi32>
    %62 = arith.cmpi eq, %23, %61 : vector<1x4xi32>
    %63 = arith.extui %62 : vector<1x4xi1> to vector<1x4xi32>
    %64 = arith.sitofp %63 : vector<1x4xi32> to vector<1x4xf32>
    %65 = vector.broadcast %56 : vector<32x1xf32> to vector<32x4xf32>
    %66 = vector.broadcast %64 : vector<1x4xf32> to vector<32x4xf32>
    %67 = arith.mulf %65, %66 : vector<32x4xf32>
    %68 = arith.addf %45, %67 : vector<32x4xf32>
    %69 = vector.broadcast %60 : vector<1x1xf32> to vector<1x4xf32>
    %70 = arith.mulf %69, %64 : vector<1x4xf32>
    %71 = arith.addf %48, %70 : vector<1x4xf32>
    %c2_i32 = arith.constant 2 : i32
    %72 = vector.broadcast %c2_i32 : i32 to vector<1x256xi32>
    %73 = arith.cmpi eq, %22, %72 : vector<1x256xi32>
    %cst_19 = arith.constant 0.000000e+00 : f32
    %74 = vector.shape_cast %73 : vector<1x256xi1> to vector<1x256xi1>
    %75 = vector.broadcast %74 : vector<1x256xi1> to vector<32x256xi1>
    %76 = vector.broadcast %cst_19 : f32 to vector<32x256xf32>
    %77 = arith.select %75, %14, %76 : vector<32x256xi1>, vector<32x256xf32>
    %cst_20 = arith.constant dense<0.000000e+00> : vector<32xf32>
    %78 = vector.multi_reduction <add>, %77, %cst_20 [1] : vector<32x256xf32> to vector<32xf32>
    %79 = vector.shape_cast %78 : vector<32xf32> to vector<32x1xf32>
    %80 = arith.extui %73 : vector<1x256xi1> to vector<1x256xi32>
    %81 = arith.sitofp %80 : vector<1x256xi32> to vector<1x256xf32>
    %cst_21 = arith.constant dense<0.000000e+00> : vector<1xf32>
    %82 = vector.multi_reduction <add>, %81, %cst_21 [1] : vector<1x256xf32> to vector<1xf32>
    %83 = vector.shape_cast %82 : vector<1xf32> to vector<1x1xf32>
    %c2_i32_22 = arith.constant 2 : i32
    %84 = vector.broadcast %c2_i32_22 : i32 to vector<1x4xi32>
    %85 = arith.cmpi eq, %23, %84 : vector<1x4xi32>
    %86 = arith.extui %85 : vector<1x4xi1> to vector<1x4xi32>
    %87 = arith.sitofp %86 : vector<1x4xi32> to vector<1x4xf32>
    %88 = vector.broadcast %79 : vector<32x1xf32> to vector<32x4xf32>
    %89 = vector.broadcast %87 : vector<1x4xf32> to vector<32x4xf32>
    %90 = arith.mulf %88, %89 : vector<32x4xf32>
    %91 = arith.addf %68, %90 : vector<32x4xf32>
    %92 = vector.broadcast %83 : vector<1x1xf32> to vector<1x4xf32>
    %93 = arith.mulf %92, %87 : vector<1x4xf32>
    %94 = arith.addf %71, %93 : vector<1x4xf32>
    %c3_i32 = arith.constant 3 : i32
    %95 = vector.broadcast %c3_i32 : i32 to vector<1x256xi32>
    %96 = arith.cmpi eq, %22, %95 : vector<1x256xi32>
    %cst_23 = arith.constant 0.000000e+00 : f32
    %97 = vector.shape_cast %96 : vector<1x256xi1> to vector<1x256xi1>
    %98 = vector.broadcast %97 : vector<1x256xi1> to vector<32x256xi1>
    %99 = vector.broadcast %cst_23 : f32 to vector<32x256xf32>
    %100 = arith.select %98, %14, %99 : vector<32x256xi1>, vector<32x256xf32>
    %cst_24 = arith.constant dense<0.000000e+00> : vector<32xf32>
    %101 = vector.multi_reduction <add>, %100, %cst_24 [1] : vector<32x256xf32> to vector<32xf32>
    %102 = vector.shape_cast %101 : vector<32xf32> to vector<32x1xf32>
    %103 = arith.extui %96 : vector<1x256xi1> to vector<1x256xi32>
    %104 = arith.sitofp %103 : vector<1x256xi32> to vector<1x256xf32>
    %cst_25 = arith.constant dense<0.000000e+00> : vector<1xf32>
    %105 = vector.multi_reduction <add>, %104, %cst_25 [1] : vector<1x256xf32> to vector<1xf32>
    %106 = vector.shape_cast %105 : vector<1xf32> to vector<1x1xf32>
    %c3_i32_26 = arith.constant 3 : i32
    %107 = vector.broadcast %c3_i32_26 : i32 to vector<1x4xi32>
    %108 = arith.cmpi eq, %23, %107 : vector<1x4xi32>
    %109 = arith.extui %108 : vector<1x4xi1> to vector<1x4xi32>
    %110 = arith.sitofp %109 : vector<1x4xi32> to vector<1x4xf32>
    %111 = vector.broadcast %102 : vector<32x1xf32> to vector<32x4xf32>
    %112 = vector.broadcast %110 : vector<1x4xf32> to vector<32x4xf32>
    %113 = arith.mulf %111, %112 : vector<32x4xf32>
    %114 = arith.addf %91, %113 : vector<32x4xf32>
    %115 = vector.broadcast %106 : vector<1x1xf32> to vector<1x4xf32>
    %116 = arith.mulf %115, %110 : vector<1x4xf32>
    %117 = arith.addf %94, %116 : vector<1x4xf32>
    %c0_27 = arith.constant 0 : index
    %c0_28 = arith.constant 0 : index
    %c0_29 = arith.constant 0 : index
    %118 = vector.load %arg4[%c0_27, %c0_28, %c0_29] : memref<1x32x4xf32, #tpu.memory_space<vmem>>, vector<1x32x4xf32>
    %119 = vector.shape_cast %118 : vector<1x32x4xf32> to vector<32x4xf32>
    %120 = arith.addf %119, %114 : vector<32x4xf32>
    %c0_30 = arith.constant 0 : index
    %c0_31 = arith.constant 0 : index
    %c0_32 = arith.constant 0 : index
    %121 = vector.load %arg4[%c0_30, %c0_31, %c0_32] : memref<1x32x4xf32, #tpu.memory_space<vmem>>, vector<1x32x4xf32>
    %122 = vector.shape_cast %121 : vector<1x32x4xf32> to vector<32x4xf32>
    %123 = vector.shape_cast %120 : vector<32x4xf32> to vector<1x32x4xf32>
    tpu.vector_store %arg4[%c0_30, %c0_31, %c0_32], %123 {strides = array<i32>} : memref<1x32x4xf32, #tpu.memory_space<vmem>>, vector<1x32x4xf32>,
    %c0_33 = arith.constant 0 : index
    %c0_34 = arith.constant 0 : index
    %c0_35 = arith.constant 0 : index
    %124 = vector.load %arg5[%c0_33, %c0_34, %c0_35] : memref<1x1x4xf32, #tpu.memory_space<vmem>>, vector<1x1x4xf32>
    %125 = vector.shape_cast %124 : vector<1x1x4xf32> to vector<1x4xf32>
    %126 = arith.addf %125, %117 : vector<1x4xf32>
    %c0_36 = arith.constant 0 : index
    %c0_37 = arith.constant 0 : index
    %c0_38 = arith.constant 0 : index
    %127 = vector.load %arg5[%c0_36, %c0_37, %c0_38] : memref<1x1x4xf32, #tpu.memory_space<vmem>>, vector<1x1x4xf32>
    %128 = vector.shape_cast %127 : vector<1x1x4xf32> to vector<1x4xf32>
    %129 = vector.shape_cast %126 : vector<1x4xf32> to vector<1x1x4xf32>
    tpu.vector_store %arg5[%c0_36, %c0_37, %c0_38], %129 {strides = array<i32>} : memref<1x1x4xf32, #tpu.memory_space<vmem>>, vector<1x1x4xf32>,
    return
  }
  func.func @transform_0(%arg0: i32, %arg1: i32) -> (i32, i32, i32) {
    %c0_i32 = arith.constant 0 : i32
    %c0_i32_0 = arith.constant 0 : i32
    return %arg0, %c0_i32, %arg1 : i32, i32, i32
  }
  func.func @transform_1(%arg0: i32, %arg1: i32) -> (i32, i32, i32) {
    %c0_i32 = arith.constant 0 : i32
    %c0_i32_0 = arith.constant 0 : i32
    return %arg0, %c0_i32, %arg1 : i32, i32, i32
  }
  func.func @transform_2(%arg0: i32, %arg1: i32) -> (i32, i32, i32) {
    %c0_i32 = arith.constant 0 : i32
    %c0_i32_0 = arith.constant 0 : i32
    %c0_i32_1 = arith.constant 0 : i32
    return %arg0, %c0_i32, %c0_i32_0 : i32, i32, i32
  }
  func.func @transform_3(%arg0: i32, %arg1: i32) -> (i32, i32, i32) {
    %c0_i32 = arith.constant 0 : i32
    %c0_i32_0 = arith.constant 0 : i32
    %c0_i32_1 = arith.constant 0 : i32
    return %arg0, %c0_i32, %c0_i32_0 : i32, i32, i32
  }
}

</mosaic_0001>

<bundles_post_ra>
// kernel: tpu_custom_call.1
= control target key start
LH: loop header
LB: loop body
LE: loop exit
PB: predicated region body
PF: predicated region fallthrough
CT: control target
= control target key end

     0   :  { %9 = vsyncpa [#allocation3], 0  ;;  %s1423_s0 = inlined_call_operand.hbm [shape: f32[2,32,256], index: 0, kind: input, shape index: {}]   ;;  %s1424_s1 = inlined_call_operand.hbm [shape: s32[2,1,256], index: 1, kind: input, shape index: {}]   ;;  %s1425_s2 = inlined_call_operand.vmem [shape: f32[2,32,4], index: 2, kind: output, shape index: {0}]   ;;  %s1426_s3 = inlined_call_operand.hbm [shape: f32[2,1,4], index: 3, kind: output, shape index: {1}]  }
   0x1   :  { %11 = vsyncpa [#allocation3 + $0x1], 0 }
   0x2   :  { %12 = vsyncpa [#allocation6], 0 }
   0x3   :  { %14 = vsyncpa [#allocation6 + $0x1], 0 }
   0x4   :  { %15 = vsyncpa [#allocation4], 0 }
   0x5   :  { %17 = vsyncpa [#allocation4 + $0x1], 0  ;;  %s988_s12 = smov 0   ;;  %s990_s13 = smov 0  }
   0x6   :  { %s992_s14 = smov 0   ;;  %s994_s15 = smov 0  }
   0x7   :  { %s996_s16 = smov 0   ;;  %s998_s17 = smov 0  }
   0x8 LB: > { %s711_s18 = sadd.s32 4294967295, %s962_s17   ;;  %s712_s19 = sadd.s32 4294967294, %s962_s17   ;;  %s962_s17 = sphi %s998_s17, %s23_s17   ;;  %s958_s16 = sphi %s996_s16, %s1452_s16   ;;  %s954_s15 = sphi %s994_s15, %s1451_s15   ;;  %s950_s14 = sphi %s992_s14, %s1450_s14   ;;  %s946_s13 = sphi %s990_s13, %s1449_s13   ;;  %s942_s12 = sphi %s988_s12, %s1448_s12  }
   0x9   : > { %s35_s20 = sadd.s32 1, %s958_s16  ;;  %s44_s21 = sadd.s32 1, %s950_s14 }
   0xa   : > { %p37_p0 = scmp.ge.s32.totalorder %s35_s20, 2  ;;  %p51_p1 = scmp.ne.s32.totalorder %s950_s14, %s946_s13 }
   0xb   : > { %p52_p2 = scmp.eq.s32.totalorder %s962_s17, 0  ;;  %p57_p3 = scmp.ne.s32.totalorder %s946_s13, %s942_s12 }
   0xc   : > { %s1454_s20 = smov (%p37_p0, %s35_s20), 0  ;;  %p58_p5 = scmp.eq.s32.totalorder %s711_s18, 0 }
   0xd   : > { %p1029_p4 = por %p52_p2, %p51_p1  ;;  %s39_s23 = ssub.s32 %s958_s16, %s1454_s20 }
   0xe   : > { %p135_p6 = scmp.eq.s32.totalorder %s711_s18, 1  ;;  %p42_p7 = scmp.eq.s32.totalorder %s39_s23, 0 }
   0xf   : > { %p1035_p8 = por %p58_p5, %p57_p3  ;;  %p141_p10 = scmp.eq.s32.totalorder %s712_s19, 1 }
  0x10   : > { %p1039_p9 = por %p135_p6, %p51_p1  ;;  %p714_p12 = scmp.ge.s32.totalorder %s962_s17, 2 }
  0x11   : > { %s1044_s26 = scalar_select %p42_p7, %s950_s14, %s44_s21  }
  0x12   : > { %p1046_p11 = por %p141_p10, %p57_p3  ;;  %p758_p13 = scmp.lt.s32.totalorder %s962_s17, 2 }
  0x13   : > { %s161_s28 = sand.u32 1, %s950_s14   ;;  %s739_s30 = sshll.u32 %s958_s16, 6 }
  0x14   : > { %s715_s29 = sshll.u32 %s161_s28, 6  ;;  %s172_s6 = scalar_lea.hbm %s1423_s0, %s739_s30 }
  0x15   : > { %s165_s7 = scalar_lea.vmem [#allocation2], %s715_s29  ;;  %s173_s9 = sshll.u32 %s172_s6, 4  ;;  %s174_s9 = int_to_ptr.hbm [resolvable:$true] %s173_s9 }
  0x16   : > { %s175_s8 = sshll.u32 %s165_s7, 4  ;;  %p1059_p0 = pnand %p758_p13, %p1029_p4  ;;  %s176_s8 = int_to_ptr.vmem [resolvable:$true] %s175_s8 }
  0x17   : > { %p720_p1 = scmp.ge.s32.totalorder %s962_s17, 1  ;;  %s162_s11 = scalar_lea.sflag [#allocation3], %s161_s28 }
  0x18   : > { %s964_s18 = smov 256   ;;  %s965_s19 = smov 16  }
  0x19   : > { %750 = dma.hbm_to_vmem [thread:$0]  (!%p1059_p0), %s174_s9, 1024, %s176_s8, %s162_s11, %s964_s18, %s964_s18, %s965_s19  }
  0x1a   : > { %p204_p2 = scmp.lt.s32.totalorder %s962_s17, 3  ;;  %s718_s21 = sshll.u32 %s161_s28, 1 }
  0x1b   : > { %s719_s23 = sshll.u32 %s958_s16, 1  ;;  %s189_s4 = scalar_lea.vmem [#allocation5], %s718_s21 }
  0x1c   : > { %p205_p3 = pnand %p720_p1, %p204_p2  ;;  %s195_s22 = scalar_lea.hbm %s1424_s1, %s719_s23 }
  0x1d   : > { %s199_s5 = sshll.u32 %s189_s4, 4  ;;  %s197_s6 = sshll.u32 %s195_s22, 4  ;;  %s200_s5 = int_to_ptr.vmem [resolvable:$true] %s199_s5  ;;  %s198_s6 = int_to_ptr.hbm [resolvable:$true] %s197_s6 }
  0x1e   : > { %s186_s7 = scalar_lea.sflag [#allocation6], %s161_s28  ;;  %208 = sbr.rel (%p205_p3) target bundleno = 258 (0x102), region = 28 }
  0x1f   : > { %753 = dma.hbm_to_vmem [thread:$0]  (!%p1059_p0), %s198_s6, 32, %s200_s5, %s186_s7  }
  0x20   : > { %s1074_s8 = sand.u32 (!%p205_p3), 1, %s946_s13  }
  0x21   : > { %s721_s9 = sshll.u32 (!%p205_p3), %s1074_s8, 6  ;;  %s211_s11 = scalar_lea.sflag (!%p205_p3), [#allocation3], %s1074_s8 }
  0x22   : > { %s1078_s18 = scalar_lea.vmem (!%p205_p3), [#allocation2], %s721_s9 }
  0x23   : > { %929 = dma.done.wait (%p1035_p8), %s211_s11, 1024  }
  0x24   : > { %931 = vsyncadd (%p1035_p8), %s211_s11, 4294966272  ;;  %s722_s28 = sshll.u32 %s1074_s8, 1  ;;  %s221_s10 = scalar_lea.sflag [#allocation6], %s1074_s8 }
  0x25   : > { %s224_s19 = scalar_lea.vmem [#allocation5], %s722_s28 }
  0x26   : > { %933 = dma.done.wait (%p1035_p8), %s221_s10, 32  }
  0x27   : > { %935 = vsyncadd (%p1035_p8), %s221_s10, 4294967264  ;;  %v283_v0 = vld [vmem:[%s224_s19] sm:$0x3]  ;;  %vm383_vm0 = vcmask 1040384   ;;  %v966_v3 = vmov 0.0   ;;  %v1120_v14 = vld [vmem:[%s1078_s18 + $0x8] sm:$0xff]  ;;  %s580_s29 = scalar_lea.hbm %s1426_s3, %s954_s15 }
  0x28   : > { %v1090_v1 = vperm.slane %v283_v0, 0  ;;  %v1092_v2 = vperm.slane %v283_v0, 1  ;;  %v1114_v12 = vld [vmem:[%s1078_s18] sm:$0xff]  ;;  %v1123_v15 = vld [vmem:[%s1078_s18 + $0x10] sm:$0xff]  ;;  %v1126_v17 = vld [vmem:[%s1078_s18 + $0x18] sm:$0xff]  ;;  %v285_v24 = vmul.f32 %v1120_v14, %v1120_v14  ;;  %v967_v62 = vmov 0  }
  0x29   : > { %v284_v20 = vmul.f32 %v1114_v12, %v1114_v12  ;;  %v1139_v23 = vld [vmem:[%s1078_s18 + $0x20] sm:$0xff]  ;;  %v286_v25 = vmul.f32 %v1123_v15, %v1123_v15  ;;  %v1148_v27 = vld [vmem:[%s1078_s18 + $0x28] sm:$0xff]  ;;  %v287_v28 = vmul.f32 %v1126_v17, %v1126_v17  ;;  %v1159_v31 = vld [vmem:[%s1078_s18 + $0x30] sm:$0xff]  ;;  %s1313_s24 = scalar_lea.vmem [#allocation7], %s1074_s8  ;;  %s584_s22 = sshll.u32 %s580_s29, 4  ;;  %s585_s22 = int_to_ptr.hbm [resolvable:$true] %s584_s22 }
  0x2a   : > { %vm353_vm1 = vcmp.eq.s32.totalorder %v1090_v1, 0  ;;  %vm354_vm2 = vcmp.eq.s32.totalorder %v1092_v2, 0  ;;  %vm402_vm3 = vcmp.eq.s32.totalorder %v1090_v1, 1  ;;  %vm403_vm4 = vcmp.eq.s32.totalorder %v1092_v2, 1  ;;  %v1162_v32 = vld [vmem:[%s1078_s18 + $0x38] sm:$0xff]  ;;  %s582_s30 = sshll.u32 %s1313_s24, 4  ;;  %s583_s30 = int_to_ptr.vmem [resolvable:$true] %s582_s30 }
  0x2b   : > { %v725_v4 = vsel %vm353_vm1, 1.0, %v966_v3  ;;  %v726_v5 = vsel %vm354_vm2, 1.0, %v966_v3  ;;  %v728_v9 = vsel %vm402_vm3, 1.0, %v966_v3  ;;  %v729_v10 = vsel %vm403_vm4, 1.0, %v966_v3  ;;  %s569_s4 = scalar_lea.sflag [#allocation4], %s1074_s8  ;;  %s890_s5 = sshra.s32 %s585_s22, 4  ;;  %s891_s5 = int_to_ptr.hbm [resolvable:$true] %s890_s5 }
  0x2c   : > { %v384_v6 = vsel %vm383_vm0, %v725_v4, 0.0  ;;  %v385_v7 = vsel %vm383_vm0, %v726_v5, 0.0  ;;  %v432_v11 = vsel %vm383_vm0, %v728_v9, 0.0  ;;  %v433_v13 = vsel %vm383_vm0, %v729_v10, 0.0  ;;  %s892_s6 = scalar_lea.hbm %s891_s5, 1  ;;  %s896_s11 = scalar_lea.hbm %s1426_s3, 2 }
  0x2d   : > { %v386_v8 = vadd.f32 %v385_v7, %v384_v6  ;;  %vm450_vm5 = vcmp.eq.s32.totalorder %v1090_v1, 2  ;;  %vm451_vm6 = vcmp.eq.s32.totalorder %v1092_v2, 2  ;;  %v434_v16 = vadd.f32 %v433_v13, %v432_v11  ;;  %p893_p4 = scmp.ne.s32.totalorder %s891_s5, %s892_s6  ;;  %p897_p7 = scmp.lt.s32.totalorder %s891_s5, %s1426_s3 }
  0x2e   : > { %v731_v18 = vsel %vm450_vm5, 1.0, %v966_v3  ;;  %v732_v19 = vsel %vm451_vm6, 1.0, %v966_v3  ;;  %vm498_vm7 = vcmp.eq.s32.totalorder %v1090_v1, 3  ;;  %vm499_vm8 = vcmp.eq.s32.totalorder %v1092_v2, 3  ;;  %p898_p8 = scmp.lt.s32.totalorder %s896_s11, %s892_s6 }
  0x2f   : > { %387 = vadd.xlane.f32.xlu1 %v386_v8  ;;  %435 = vadd.xlane.f32.xlu2 %v434_v16  ;;  %v480_v21 = vsel %vm383_vm0, %v731_v18, 0.0  ;;  %v481_v22 = vsel %vm383_vm0, %v732_v19, 0.0  ;;  %v734_v29 = vsel %vm498_vm7, 1.0, %v966_v3  ;;  %v735_v30 = vsel %vm499_vm8, 1.0, %v966_v3  ;;  %p894_p5 = pnand %p893_p4, %p1039_p9 }
  0x30   : > { %v482_v26 = vadd.f32 %v481_v22, %v480_v21  ;;  %v528_v33 = vsel %vm383_vm0, %v734_v29, 0.0  ;;  %v529_v34 = vsel %vm383_vm0, %v735_v30, 0.0  ;;  %v288_v35 = vmul.f32 %v1139_v23, %v1139_v23  ;;  %p899_p10 = por %p898_p8, %p897_p7 }
  0x31   : > { %v530_v36 = vadd.f32 %v529_v34, %v528_v33  ;;  %v289_v37 = vmul.f32 %v1148_v27, %v1148_v27  ;;  %v290_v38 = vmul.f32 %v1159_v31, %v1159_v31  ;;  %v291_v39 = vmul.f32 %v1162_v32, %v1162_v32  ;;  %p895_p6 = pneg %p894_p5 }
  0x32   : > { %v292_v40 = vadd.f32 %v286_v25, %v284_v20  ;;  %v301_v41 = vadd.f32 %v287_v28, %v285_v24  ;;  %v356_v63 = vsel %vm354_vm2, 1, %v967_v62  ;;  %v355_v4 = vsel %vm353_vm1, 1, %v967_v62 }
  0x33   : > { %531 = vadd.xlane.f32.xlu0 %v530_v36  ;;  %v405_v6 = vsel %vm403_vm4, 1, %v967_v62  ;;  %v358_v8 = vperm.slane %v356_v63, 0  ;;  %v357_v10 = vperm.slane %v355_v4, 0  ;;  %v404_v19 = vsel %vm402_vm3, 1, %v967_v62  ;;  %p900_p13 = pnand %p899_p10, %p895_p6 }
  0x34   : > { %v293_v42 = vadd.f32 %v292_v40, %v288_v35  ;;  %v302_v43 = vadd.f32 %v301_v41, %v289_v37  ;;  %v407_v13 = vperm.slane %v405_v6, 0  ;;  %v406_v29 = vperm.slane %v404_v19, 0 }
  0x35   : > { %vm1182_vm14 = vcmp.eq.s32.totalorder %v358_v8, 1  ;;  %vm1186_vm0 = vcmp.eq.s32.totalorder %v357_v10, 1  ;;  %v452_v30 = vsel %vm450_vm5, 1, %v967_v62  ;;  %v501_v33 = vsel %vm499_vm8, 1, %v967_v62 }
  0x36   : > { %v294_v44 = vadd.f32 %v293_v42, %v290_v38  ;;  %v303_v45 = vadd.f32 %v302_v43, %v291_v39  ;;  %vm1190_vm1 = vcmp.eq.s32.totalorder %v407_v13, 1  ;;  %v503_v42 = vperm.slane %v501_v33, 0 }
  0x37   : > { %483 = vadd.xlane.f32.xlu1 %v482_v26  ;;  %v500_v26 = vsel %vm498_vm7, 1, %v967_v62  ;;  %vm1227_vm2 = vcmp.eq.s32.totalorder %v406_v29, 1  ;;  %vm273_vm7 = vcmask 24576   ;;  %v340_v25 = vlaneseq }
  0x38   : > { %v295_v46 = vrot.slane %v294_v44, 4  ;;  %v304_v47 = vrot.slane %v303_v45, 4  ;;  %v502_v39 = vperm.slane %v500_v26, 0  ;;  %vm1238_vm4 = vcmp.eq.s32.totalorder %v503_v42, 1  ;;  %274 = vst.msk [vmem:[%s1313_s24] sm:$0x1] %vm273_vm7, %v966_v3 }
  0x3a   : > { %v296_v48 = vadd.f32 %v295_v46, %v294_v44  ;;  %v305_v49 = vadd.f32 %v304_v47, %v303_v45  ;;  %vm1233_vm3 = vcmp.eq.s32.totalorder %v502_v39, 1 }
  0x3c   : > { %v297_v50 = vrot.slane %v296_v48, 2  ;;  %v306_v51 = vrot.slane %v305_v49, 2 }
  0x3e   : > { %v298_v52 = vadd.f32 %v297_v50, %v296_v48  ;;  %v307_v53 = vadd.f32 %v306_v51, %v305_v49  ;;  %v453_v48 = vsel %vm451_vm6, 1, %v967_v62  ;;  %v454_v51 = vperm.slane %v452_v30, 0 }
  0x40   : > { %v299_v54 = vrot.slane %v298_v52, 1  ;;  %v308_v55 = vrot.slane %v307_v53, 1  ;;  %vm1260_vm5 = vcmp.eq.s32.totalorder %v454_v51, 1 }
  0x42   : > { %v300_v56 = vadd.f32 %v299_v54, %v298_v52  ;;  %v309_v57 = vadd.f32 %v308_v55, %v307_v53  ;;  %v455_v54 = vperm.slane %v453_v48, 0  ;;  %v559_v48 = vld [vmem:[%s1313_s24] sm:$0x1] }
  0x44   : > { %v310_v58 = vmax.f32 %v300_v56, 1e-24  ;;  %v311_v59 = vmax.f32 %v309_v57, 1e-24  ;;  %vm1270_vm6 = vcmp.eq.s32.totalorder %v455_v54, 1 }
  0x46   : > { %812 = vrsqrt.f32 %v310_v58  ;;  %vm318_vm9 = vweird.f32 %v310_v58  ;;  %vm328_vm11 = vweird.f32 %v311_v59 }
  0x47   : > { %814 = vrsqrt.f32 %v311_v59 }
  0x4c   : > { %v813_v60 = vpop.eup %812 }
  0x4d   : > { %v815_v61 = vpop.eup %814  ;;  %v313_v0 = vmul.f32 %v813_v60, %v310_v58  ;;  %vm319_vm10 = vweird.f32 %v813_v60 }
  0x4e   : > { %v323_v5 = vmul.f32 %v815_v61, %v311_v59  ;;  %vm329_vm12 = vweird.f32 %v815_v61  ;;  %vm320_vm13 = vmor %vm318_vm9, %vm319_vm10 }
  0x4f   : > { %v314_v7 = vmul.f32 %v813_v60, %v313_v0  ;;  %vm330_vm15 = vmor %vm328_vm11, %vm329_vm12 }
  0x50   : > { %v324_v9 = vmul.f32 %v815_v61, %v323_v5 }
  0x51   : > { %v315_v11 = vmul.f32 0.5, %v314_v7 }
  0x52   : > { %v325_v16 = vmul.f32 0.5, %v324_v9 }
  0x53   : > { %v316_v18 = vsub.f32 1.5, %v315_v11 }
  0x54   : > { %v326_v20 = vsub.f32 1.5, %v325_v16 }
  0x55   : > { %v317_v22 = vmul.f32 %v813_v60, %v316_v18 }
  0x56   : > { %v327_v28 = vmul.f32 %v815_v61, %v326_v20 }
  0x57   : > { %v321_v34 = vsel %vm320_vm13, %v813_v60, %v317_v22 }
  0x58   : > { %v331_v35 = vsel %vm330_vm15, %v815_v61, %v327_v28  ;;  %v1201_v36 = vmul.f32 %v321_v34, %v1159_v31  ;;  %v336_v37 = vmul.f32 %v321_v34, %v1139_v23  ;;  %v332_v38 = vmul.f32 %v321_v34, %v1114_v12 }
  0x59   : > { %v1206_v40 = vmul.f32 %v331_v35, %v1162_v32  ;;  %v337_v41 = vmul.f32 %v331_v35, %v1148_v27  ;;  %v333_v1 = vmul.f32 %v331_v35, %v1120_v14  ;;  %v1225_v32 = vmul.f32 %v321_v34, %v1123_v15 }
  0x5a   : > { %v367_v43 = vsel %vm1186_vm0, %v1201_v36, 0.0  ;;  %v365_v31 = vsel %vm1186_vm0, %v336_v37, 0.0  ;;  %v361_v23 = vsel %vm1186_vm0, %v332_v38, 0.0  ;;  %v335_v50 = vmul.f32 %v331_v35, %v1126_v17 }
  0x5b   : > { %v368_v12 = vsel %vm1182_vm14, %v1206_v40, 0.0  ;;  %v366_v27 = vsel %vm1182_vm14, %v337_v41, 0.0  ;;  %v362_v14 = vsel %vm1182_vm14, %v333_v1, 0.0  ;;  %v414_v52 = vsel %vm1227_vm2, %v336_v37, 0.0 }
  0x5c   : > { %v378_v45 = vadd.f32 %v368_v12, %v367_v43  ;;  %v375_v46 = vadd.f32 %v366_v27, %v365_v31  ;;  %v369_v47 = vadd.f32 %v362_v14, %v361_v23  ;;  %v415_v2 = vsel %vm1190_vm1, %v337_v41, 0.0 }
  0x5d   : > { %v412_v53 = vsel %vm1227_vm2, %v1225_v32, 0.0  ;;  %v413_v17 = vsel %vm1190_vm1, %v335_v50, 0.0  ;;  %v363_v55 = vsel %vm1186_vm0, %v1225_v32, 0.0  ;;  %v364_v56 = vsel %vm1182_vm14, %v335_v50, 0.0 }
  0x5e   : > { %379 = vadd.xlane.f32.xlu2 %v378_v45  ;;  %376 = vadd.xlane.f32.xlu1 %v375_v46  ;;  %v506_v57 = vsel %vm1233_vm3, %v332_v38, 0.0  ;;  %v507_v58 = vsel %vm1238_vm4, %v333_v1, 0.0  ;;  %v424_v59 = vadd.f32 %v415_v2, %v414_v52  ;;  %v421_v60 = vadd.f32 %v413_v17, %v412_v53 }
  0x5f   : > { %370 = vadd.xlane.f32.xlu0 %v369_v47  ;;  %v514_v61 = vadd.f32 %v507_v58, %v506_v57  ;;  %v372_v63 = vadd.f32 %v364_v56, %v363_v55  ;;  %v512_v0 = vsel %vm1233_vm3, %v1201_v36, 0.0  ;;  %v513_v4 = vsel %vm1238_vm4, %v1206_v40, 0.0 }
  0x60   : > { %v523_v6 = vadd.f32 %v513_v4, %v512_v0  ;;  %v508_v7 = vsel %vm1233_vm3, %v1225_v32, 0.0  ;;  %v509_v8 = vsel %vm1238_vm4, %v335_v50, 0.0  ;;  %v510_v10 = vsel %vm1233_vm3, %v336_v37, 0.0 }
  0x61   : > { %v517_v9 = vadd.f32 %v509_v8, %v508_v7  ;;  %v511_v11 = vsel %vm1238_vm4, %v337_v41, 0.0  ;;  %v462_v16 = vsel %vm1260_vm5, %v336_v37, 0.0  ;;  %v463_v18 = vsel %vm1270_vm6, %v337_v41, 0.0 }
  0x62   : > { %v520_v13 = vadd.f32 %v511_v11, %v510_v10  ;;  %v458_v19 = vsel %vm1260_vm5, %v332_v38, 0.0  ;;  %v459_v20 = vsel %vm1270_vm6, %v333_v1, 0.0  ;;  %v410_v21 = vsel %vm1227_vm2, %v332_v38, 0.0 }
  0x63   : > { %v411_v22 = vsel %vm1190_vm1, %v333_v1, 0.0  ;;  %v472_v24 = vadd.f32 %v463_v18, %v462_v16  ;;  %v466_v26 = vadd.f32 %v459_v20, %v458_v19  ;;  %v464_v29 = vsel %vm1260_vm5, %v1201_v36, 0.0 }
  0x64   : > { %v418_v28 = vadd.f32 %v411_v22, %v410_v21  ;;  %v465_v30 = vsel %vm1270_vm6, %v1206_v40, 0.0  ;;  %v416_v33 = vsel %vm1227_vm2, %v1201_v36, 0.0  ;;  %v417_v34 = vsel %vm1190_vm1, %v1206_v40, 0.0 }
  0x65   : > { %v475_v35 = vadd.f32 %v465_v30, %v464_v29  ;;  %v427_v37 = vadd.f32 %v417_v34, %v416_v33  ;;  %v460_v38 = vsel %vm1260_vm5, %v1225_v32, 0.0  ;;  %v461_v39 = vsel %vm1270_vm6, %v335_v50, 0.0 }
  0x66   : > { %425 = vadd.xlane.f32.xlu2 %v424_v59  ;;  %422 = vadd.xlane.f32.xlu1 %v421_v60  ;;  %v469_v41 = vadd.f32 %v461_v39, %v460_v38  ;;  %v341_v36 = vand.u32 127, %v340_v25 }
  0x67   : > { %373 = vadd.xlane.f32.xlu0 %v372_v63 }
  0x68   : > { %vm389_vm8 = vcmp.eq.s32.totalorder %v341_v36, 0  ;;  %vm437_vm9 = vcmp.eq.s32.totalorder %v341_v36, 1  ;;  %vm485_vm10 = vcmp.eq.s32.totalorder %v341_v36, 2  ;;  %vm533_vm11 = vcmp.eq.s32.totalorder %v341_v36, 3 }
  0x69   : > { %v1319_v40 = vsel %vm389_vm8, 1.0, %v966_v3  ;;  %v1322_v42 = vsel %vm437_vm9, 1.0, %v966_v3  ;;  %v1327_v12 = vsel %vm485_vm10, 1.0, %v966_v3  ;;  %v1330_v14 = vsel %vm533_vm11, 1.0, %v966_v3 }
  0x6e   : > { %473 = vadd.xlane.f32.xlu1 %v472_v24  ;;  %467 = vadd.xlane.f32.xlu2 %v466_v26 }
  0x6f   : > { %419 = vadd.xlane.f32.xlu0 %v418_v28 }
  0x76   : > { %515 = vadd.xlane.f32.xlu1 %v514_v61  ;;  %476 = vadd.xlane.f32.xlu2 %v475_v35 }
  0x77   : > { %428 = vadd.xlane.f32.xlu0 %v427_v37 }
  0x7e   : > { %524 = vadd.xlane.f32.xlu1 %v523_v6  ;;  %518 = vadd.xlane.f32.xlu2 %v517_v9 }
  0x7f   : > { %470 = vadd.xlane.f32.xlu0 %v469_v41 }
  0x87   : > { %521 = vadd.xlane.f32.xlu0 %v520_v13 }
  0xa2   : > { %v388_v1 = vpop.xlane.xlu1 %387  ;;  %v436_v31 = vpop.xlane.xlu2 %435 }
  0xa3   : > { %v400_v43 = vmul.f32 %v1319_v40, %v388_v1  ;;  %v448_v23 = vmul.f32 %v1322_v42, %v436_v31 }
  0xa5   : > { %v449_v27 = vadd.f32 %v448_v23, %v400_v43 }
  0xa6   : > { %v532_v45 = vpop.xlane.xlu0 %531 }
  0xa7   : > { %v544_v46 = vmul.f32 %v1330_v14, %v532_v45 }
  0xaa   : > { %v484_v32 = vpop.xlane.xlu1 %483 }
  0xab   : > { %v496_v44 = vmul.f32 %v1327_v12, %v484_v32 }
  0xad   : > { %v497_v47 = vadd.f32 %v496_v44, %v449_v27 }
  0xaf   : > { %v545_v49 = vadd.f32 %v544_v46, %v497_v47 }
  0xb1   : > { %v560_v50 = vadd.f32 %v559_v48, %v545_v49 }
  0xb3   : > { %562 = vst.msk [vmem:[%s1313_s24] sm:$0x1] %vm273_vm7, %v560_v50 }
  0xb4   : > { %903 = shalt.err (!%p900_p13)
}
  0xb5   : > { %745 = dma.vmem_to_hbm [thread:$0]  (%p1039_p9), %s583_s30, 16, %s585_s22, %s569_s4   ;;  %vm268_vm12 = vcmask 31744  }
  0xb6   : > { %p259_p0 = scmp.lt.s32.totalorder %s954_s15, 1 }
  0xb8   : > { %s1456_s15 = smov (!%p259_p0, %s954_s15), 1 }
  0xb9   : > { %s740_s8 = sshll.u32 %s1456_s15, 5 }
  0xba   : > { %s1358_s24 = scalar_lea.vmem %s1425_s2, %s740_s8 }
  0xbb   : > { %269 = vst.msk [vmem:[%s1358_s24] sm:$0xff] %vm268_vm12, %v966_v3 }
  0xbc   : > { %270 = vst.msk [vmem:[%s1358_s24 + $0x8] sm:$0xff] %vm268_vm12, %v966_v3 }
  0xbd   : > { %271 = vst.msk [vmem:[%s1358_s24 + $0x10] sm:$0xff] %vm268_vm12, %v966_v3 }
  0xbe   : > { %272 = vst.msk [vmem:[%s1358_s24 + $0x18] sm:$0xff] %vm268_vm12, %v966_v3 }
  0xc2   : > { %v546_v4 = vld [vmem:[%s1358_s24] sm:$0xff] }
  0xc3   : > { %v547_v37 = vld [vmem:[%s1358_s24 + $0x8] sm:$0xff] }
  0xc5   : > { %v549_v24 = vld [vmem:[%s1358_s24 + $0x18] sm:$0xff] }
  0xd1   : > { %v380_v51 = vpop.xlane.xlu2 %379  ;;  %v377_v15 = vpop.xlane.xlu1 %376 }
  0xd2   : > { %v371_v52 = vpop.xlane.xlu0 %370  ;;  %v395_v6 = vmul.f32 %v1319_v40, %v380_v51  ;;  %v394_v30 = vmul.f32 %v1319_v40, %v377_v15 }
  0xd3   : > { %v392_v58 = vmul.f32 %v1319_v40, %v371_v52 }
  0xd9   : > { %v426_v2 = vpop.xlane.xlu2 %425  ;;  %v423_v53 = vpop.xlane.xlu1 %422 }
  0xda   : > { %v374_v17 = vpop.xlane.xlu0 %373  ;;  %v441_v11 = vmul.f32 %v1322_v42, %v423_v53  ;;  %v442_v33 = vmul.f32 %v1322_v42, %v426_v2 }
  0xdb   : > { %v393_v13 = vmul.f32 %v1319_v40, %v374_v17  ;;  %v548_v40 = vld [vmem:[%s1358_s24 + $0x10] sm:$0xff] }
  0xdc   : > { %v446_v41 = vadd.f32 %v442_v33, %v394_v30 }
  0xdd   : > { %v445_v22 = vadd.f32 %v441_v11, %v393_v13 }
  0xe1   : > { %v474_v54 = vpop.xlane.xlu1 %473  ;;  %v468_v55 = vpop.xlane.xlu2 %467 }
  0xe2   : > { %v420_v56 = vpop.xlane.xlu0 %419  ;;  %v488_v60 = vmul.f32 %v1327_v12, %v468_v55  ;;  %v490_v38 = vmul.f32 %v1327_v12, %v474_v54 }
  0xe3   : > { %v440_v57 = vmul.f32 %v1322_v42, %v420_v56 }
  0xe4   : > { %v494_v1 = vadd.f32 %v490_v38, %v446_v41 }
  0xe5   : > { %v444_v59 = vadd.f32 %v440_v57, %v392_v58 }
  0xe7   : > { %v492_v62 = vadd.f32 %v488_v60, %v444_v59 }
  0xe9   : > { %v516_v61 = vpop.xlane.xlu1 %515  ;;  %v477_v3 = vpop.xlane.xlu2 %476 }
  0xea   : > { %v536_v63 = vmul.f32 %v1330_v14, %v516_v61  ;;  %v429_v0 = vpop.xlane.xlu0 %428  ;;  %v491_v10 = vmul.f32 %v1327_v12, %v477_v3 }
  0xeb   : > { %v443_v5 = vmul.f32 %v1322_v42, %v429_v0 }
  0xec   : > { %v540_v7 = vadd.f32 %v536_v63, %v492_v62 }
  0xed   : > { %v447_v9 = vadd.f32 %v443_v5, %v395_v6 }
  0xee   : > { %v550_v8 = vadd.f32 %v546_v4, %v540_v7 }
  0xef   : > { %v495_v19 = vadd.f32 %v491_v10, %v447_v9 }
  0xf0   : > { %555 = vst.msk [vmem:[%s1358_s24] sm:$0xff] %vm268_vm12, %v550_v8 }
  0xf1   : > { %v525_v16 = vpop.xlane.xlu1 %524  ;;  %v519_v18 = vpop.xlane.xlu2 %518 }
  0xf2   : > { %v539_v20 = vmul.f32 %v1330_v14, %v525_v16  ;;  %v471_v21 = vpop.xlane.xlu0 %470  ;;  %v537_v28 = vmul.f32 %v1330_v14, %v519_v18 }
  0xf3   : > { %v489_v26 = vmul.f32 %v1327_v12, %v471_v21 }
  0xf4   : > { %v543_v29 = vadd.f32 %v539_v20, %v495_v19 }
  0xf5   : > { %v493_v34 = vadd.f32 %v489_v26, %v445_v22 }
  0xf6   : > { %v553_v35 = vadd.f32 %v549_v24, %v543_v29 }
  0xf7   : > { %v541_v39 = vadd.f32 %v537_v28, %v493_v34 }
  0xf8   : > { %558 = vst.msk [vmem:[%s1358_s24 + $0x18] sm:$0xff] %vm268_vm12, %v553_v35 }
  0xf9   : > { %v551_v25 = vadd.f32 %v547_v37, %v541_v39 }
  0xfa   : > { %v522_v36 = vpop.xlane.xlu0 %521 }
  0xfb   : > { %556 = vst.msk [vmem:[%s1358_s24 + $0x8] sm:$0xff] %vm268_vm12, %v551_v25  ;;  %v538_v43 = vmul.f32 %v1330_v14, %v522_v36 }
  0xfd   : > { %v542_v31 = vadd.f32 %v538_v43, %v494_v1 }
  0xff   : > { %v552_v42 = vadd.f32 %v548_v40, %v542_v31 }
 0x101   : > { %557 = vst.msk [vmem:[%s1358_s24 + $0x10] sm:$0xff] %vm268_vm12, %v552_v42 }
 0x102 PF: > { %s604_s15 = sand.u32 1, %s942_s12   ;;  %p755_p9 = pnand %p714_p12, %p1046_p11 }
 0x103   : > { %s605_s25 = scalar_lea.sflag [#allocation4], %s604_s15 }
 0x104   : > { %p756_p1 = pneg %p755_p9 }
 0x106   : > { %937 = dma.done.wait (%p756_p1), %s605_s25, 16  }
 0x107   : > { %939 = vsyncadd (%p756_p1), %s605_s25, 4294967280  ;;  %s23_s17 = sadd.s32 1, %s962_s17   ;;  %s1448_s12 = smov %s946_s13 }
 0x108   : > { %p20_p2 = scmp.ge.s32.totalorder %s23_s17, 4   ;;  %s1449_s13 = smov %s950_s14 }
 0x109   : > { %s1450_s14 = smov %s1044_s26  ;;  %s1451_s15 = smov %s958_s16 }
 0x10a   : > { %s1452_s16 = smov %s1454_s20  ;;  %22 = sbr.rel (!%p20_p2) target bundleno = 8 (0x8), region = 102 }
 0x10f   :  { %610 = vsyncpa [#allocation3], 1 }
 0x110   :  { %612 = vsyncpa [#allocation3 + $0x1], 1 }
 0x111   :  { %613 = vsyncpa [#allocation6], 1 }
 0x112   :  { %615 = vsyncpa [#allocation6 + $0x1], 1 }
 0x113   :  { %616 = vsyncpa [#allocation4], 1 }
 0x114   :  { %618 = vsyncpa [#allocation4 + $0x1], 1 }

</bundles_post_ra>
